<compile_context>
chip_gen: v5e
topology: v5e:2x2
jax: 0.10.0
libtpu: 0.0.40
codegen_flags: <defaults>
</compile_context>

<pallas_src>
import numpy as np

import jax
import jax.numpy as jnp
from jax import lax
from jax.experimental import pallas as pl
from jax.experimental.pallas import tpu as pltpu


def _round_up(v, m):
    return -(-v // m) * m


# ---------------------------------------------------------------------------
# Kernel factory
# ---------------------------------------------------------------------------
def _make_wrapper_kernel(Nb, H, HP, HR, L1, L2):
    """Fused conv3x3 -> ReLU -> conv3x3 -> sigmoid on a block of Nb images.

    x_ref  : (Nb*HP, L_in)  bf16  per-image window: 1 zero halo row, H image
                                  rows, 1 zero halo row, zero pad rows
    w1_ref : (L_in, 3*L1)   bf16  merged band weights (one L1 chunk per dy)
    b1_ref : (1, L1)        f32
    w2_ref : (L1, 3*L2)     bf16
    b2_ref : (1, L2)        f32
    out_ref: (Nb*HR, L2)    f32   per-image window of HR rows (H real)
    r_ref  : (Nb*HP, 3*L1)  f32   scratch: conv1 band-matmul result
    y1_ref : (Nb*HP, L1)    bf16  scratch: relu(conv1)+zero halo (conv2 input)
    s_ref  : (Nb*HP, 3*L2)  f32   scratch: conv2 band-matmul result
    """

    def kernel(x_ref, w1_ref, b1_ref, w2_ref, b2_ref, out_ref,
               r_ref, y1_ref, s_ref):
        # conv1: ONE merged bf16 MXU matmul over all Nb images and all 3 dy taps
        r_ref[...] = jnp.dot(x_ref[...], w1_ref[...],
                             preferred_element_type=jnp.float32)

        # y1 halo / pad rows must be exact zero (they are conv2's SAME padding)
        y1_ref[...] = jnp.zeros_like(y1_ref)

        b1 = b1_ref[...]
        for i in range(Nb):                     # static unroll, Nb is small
            b = i * HP
            # dy taps = row-shifted ref loads (cheap vld), NOT value slices
            y = (r_ref[pl.ds(b + 0, H), 0:L1]
                 + r_ref[pl.ds(b + 1, H), L1:2 * L1]
                 + r_ref[pl.ds(b + 2, H), 2 * L1:3 * L1]
                 + b1)
            y1_ref[pl.ds(b + 1, H), :] = jnp.maximum(y, 0.0).astype(y1_ref.dtype)

        # conv2: ONE merged bf16 MXU matmul
        s_ref[...] = jnp.dot(y1_ref[...], w2_ref[...],
                             preferred_element_type=jnp.float32)

        b2 = b2_ref[...]
        for i in range(Nb):
            c = i * HP
            o = (s_ref[pl.ds(c + 0, H), 0:L2]
                 + s_ref[pl.ds(c + 1, H), L2:2 * L2]
                 + s_ref[pl.ds(c + 2, H), 2 * L2:3 * L2]
                 + b2)
            # wrapper's trailing activation (Sigmoid); lane-dense 128x store
            out_ref[pl.ds(i * HR, H), :] = jax.nn.sigmoid(o)
            if HR > H:  # static: zero the sublane pad rows of this image
                out_ref[pl.ds(i * HR + H, HR - H), :] = jnp.zeros(
                    (HR - H, L2), jnp.float32)

    return kernel


# ---------------------------------------------------------------------------
# Host-side weight preprocessing (one-time, tiny)
# ---------------------------------------------------------------------------
def _merged_band_weights(w_hwio, width, l_in, l_out, dtype):
    """Fold a 3x3 conv's x-taps + channel contraction into one band matrix.

    Returns B of shape (l_in, 3*l_out) such that for each dy,
      (slab @ B)[:, dy*l_out:(dy+1)*l_out]
    applies kernel row dy of the x-direction SAME conv (zero padding is
    implicit in the missing band entries).  Columns use per-x stride Cout,
    rows per-x stride Cin; trailing rows/columns (lane padding) stay zero.
    """
    w = np.asarray(w_hwio, np.float32)
    kh, kw, cin, cout = w.shape
    assert kh == 3 and kw == 3
    assert l_in >= width * cin and l_out >= width * cout
    B = np.zeros((l_in, kh * l_out), np.float32)
    for dy in range(kh):
        for x in range(width):
            for dx in range(kw):
                xin = x + dx - 1
                if 0 <= xin < width:
                    B[xin * cin:(xin + 1) * cin,
                      dy * l_out + x * cout: dy * l_out + x * cout + cout] = w[dy, dx]
    return jnp.asarray(B, dtype)


def _band_bias(b, width, l_out):
    b = np.asarray(b, np.float32).reshape(-1)
    cout = b.shape[0]
    row = np.zeros((1, l_out), np.float32)
    for x in range(width):
        row[0, x * cout: x * cout + cout] = b
    return jnp.asarray(row)


# ---------------------------------------------------------------------------
# Wrapper (ModelWrapper4Pretrained.forward)
# ---------------------------------------------------------------------------
def model_wrapper_forward(x_nchw, params, block_n=None):
    """forward(x) = sigmoid(conv2(relu(conv1(x)))) — fused Pallas kernel.

    x_nchw: (N, Cin, H, W) float32 (PyTorch layout); returns (N, Cout, H, W).
    """
    w1, b1, w2, b2 = params                      # w*: (3,3,Cin,Cout) HWIO
    N, Cin, H, W = x_nchw.shape
    C1 = w1.shape[-1]
    Cout = w2.shape[-1]

    # Lane-dense (multiple-of-128) widths for conv1 / conv2 output slabs.
    L_in = W * Cin
    L1 = max(128, _round_up(W * C1, 128))
    L2 = max(128, _round_up(W * Cout, 128))

    HP = _round_up(H + 2, 8)   # per-image rows in x / y1 slabs (1+H+1 + pad)
    HR = _round_up(H, 8)       # per-image rows in the output slab

    # Images per grid step: batch to amortize the ~600-cycle fixed per-step
    # overhead while keeping >=2 grid steps whenever N>=2 (two v7x TCs).
    if block_n is None:
        block_n = 1 if N <= 1 else min(8, pl.cdiv(N, 2))
    Nb = block_n
    Np = _round_up(N, Nb)
    n_steps = Np // Nb

    # Lane-dense input slab (bf16 MXU operand), collapsed over images.
    x_nhwc = jnp.transpose(x_nchw, (0, 2, 3, 1)).astype(jnp.float32)
    x_slab = x_nhwc.reshape(N, H, L_in)
    x_slab = jnp.pad(x_slab, ((0, Np - N), (1, HP - H - 1), (0, 0)))
    x_slab = x_slab.reshape(Np * HP, L_in).astype(jnp.bfloat16)

    # Banded weights, merged over dy (wide RHS -> one MXU matmul per conv).
    w1m = _merged_band_weights(w1, W, L_in, L1, jnp.bfloat16)   # (L_in, 3*L1)
    b1r = _band_bias(b1, W, L1)                                 # (1, L1)
    w2m = _merged_band_weights(w2, W, L1, L2, jnp.bfloat16)     # (L1, 3*L2)
    b2r = _band_bias(b2, W, L2)                                 # (1, L2)

    kernel = _make_wrapper_kernel(Nb, H, HP, HR, L1, L2)

    # FLOPs actually executed by the two band matmuls (advisory).
    flops = 2 * Np * HP * (L_in * 3 * L1 + L1 * 3 * L2)
    bytes_accessed = (2 * (x_slab.size + w1m.size + w2m.size)
                      + 4 * (b1r.size + b2r.size + Np * HR * L2))
    cost = pl.CostEstimate(flops=flops, transcendentals=Np * H * L2,
                           bytes_accessed=bytes_accessed)

    out_slab = pl.pallas_call(
        kernel,
        out_shape=jax.ShapeDtypeStruct((Np * HR, L2), jnp.float32),
        grid=(n_steps,),
        in_specs=[
            pl.BlockSpec((Nb * HP, L_in), lambda n: (n, 0)),
            pl.BlockSpec((L_in, 3 * L1), lambda n: (0, 0)),
            pl.BlockSpec((1, L1), lambda n: (0, 0)),
            pl.BlockSpec((L1, 3 * L2), lambda n: (0, 0)),
            pl.BlockSpec((1, L2), lambda n: (0, 0)),
        ],
        out_specs=pl.BlockSpec((Nb * HR, L2), lambda n: (n, 0)),
        scratch_shapes=[
            pltpu.VMEM((Nb * HP, 3 * L1), jnp.float32),
            pltpu.VMEM((Nb * HP, L1), jnp.bfloat16),
            pltpu.VMEM((Nb * HP, 3 * L2), jnp.float32),
        ],
        compiler_params=pltpu.CompilerParams(
            dimension_semantics=("parallel",)),
        cost_estimate=cost,
    )(x_slab, w1m, b1r, w2m, b2r)

    out = out_slab.reshape(Np, HR, L2)[:N, :H, :W * Cout]      # drop pads
    out = out.reshape(N, H, W, Cout)
    return jnp.transpose(out, (0, 3, 1, 2))                    # -> NCHW


# ---------------------------------------------------------------------------
# Reference + synthetic "checkpoint" weights
# ---------------------------------------------------------------------------
def _reference_forward(x_nchw, params):
    """Pure-JAX reference (lax conv, f32) for correctness check."""
    w1, b1, w2, b2 = params
    dn = lax.conv_dimension_numbers(x_nchw.shape, w1.shape,
                                    ("NCHW", "HWIO", "NCHW"))
    y = lax.conv_general_dilated(x_nchw, w1, (1, 1), "SAME",
                                 dimension_numbers=dn)
    y = y + b1.reshape(1, -1, 1, 1)
    y = jnp.maximum(y, 0.0)
    y = lax.conv_general_dilated(y, w2, (1, 1), "SAME",
                                 dimension_numbers=dn)
    y = y + b2.reshape(1, -1, 1, 1)
    return jax.nn.sigmoid(y)


def _init_params(key, cin, c1, cout):
    """Deterministic synthetic 'checkpoint' weights (stand-in for state_dict)."""
    k1, k2, k3, k4 = jax.random.split(key, 4)
    w1 = jax.random.normal(k1, (3, 3, cin, c1), jnp.float32) * 0.1   # HWIO
    b1 = jax.random.normal(k2, (1, c1), jnp.float32) * 0.1
    w2 = jax.random.normal(k3, (3, 3, c1, cout), jnp.float32) * 0.1
    b2 = jax.random.normal(k4, (1, cout), jnp.float32) * 0.1
    return w1, b1, w2, b2


if __name__ == "__main__":
    key = jax.random.PRNGKey(0)
    kx, kp = jax.random.split(key)

    N, Cin, H, W = 2, 4, 16, 16
    C1, Cout = 8, 4

    x = jax.random.normal(kx, (N, Cin, H, W), jnp.float32)
    params = _init_params(kp, Cin, C1, Cout)

    out = model_wrapper_forward(x, params)
    out = jax.block_until_ready(out)

    ref = _reference_forward(x, params)
    assert out.shape == (N, Cout, H, W)
    # bf16 MXU operands with f32 accumulation -> relaxed tolerance.
    assert jnp.allclose(out, ref, atol=2e-2, rtol=2e-2), "mismatch vs reference"

    print("KERNEL_OK")
</pallas_src>

<mosaic_0001>
module attributes {stable_mosaic.version = 11 : i64} {
  func.func @kernel(%arg0: i32, %arg1: memref<24x64xbf16, #tpu.memory_space<vmem>>, %arg2: memref<64x384xbf16, #tpu.memory_space<vmem>>, %arg3: memref<1x128xf32, #tpu.memory_space<vmem>>, %arg4: memref<128x384xbf16, #tpu.memory_space<vmem>>, %arg5: memref<1x128xf32, #tpu.memory_space<vmem>>, %arg6: memref<16x128xf32, #tpu.memory_space<vmem>>, %arg7: memref<24x384xf32, #tpu.memory_space<vmem>>, %arg8: memref<24x128xbf16, #tpu.memory_space<vmem>>, %arg9: memref<24x384xf32, #tpu.memory_space<vmem>>) attributes {dimension_semantics = [#tpu.dimension_semantics<parallel>], iteration_bounds = array<i64: 2>, scalar_prefetch = 0 : i64, scratch_operands = 3 : i64, tpu.core_type = #tpu.core_type<tc>, window_params = [{transform_indices = @transform_0, window_bounds = array<i64: 24, 64>}, {pipeline_mode = #tpu.pipeline_mode<synchronous>, transform_indices = @transform_1, window_bounds = array<i64: 64, 384>}, {pipeline_mode = #tpu.pipeline_mode<synchronous>, transform_indices = @transform_2, window_bounds = array<i64: 1, 128>}, {pipeline_mode = #tpu.pipeline_mode<synchronous>, transform_indices = @transform_3, window_bounds = array<i64: 128, 384>}, {pipeline_mode = #tpu.pipeline_mode<synchronous>, transform_indices = @transform_4, window_bounds = array<i64: 1, 128>}, {transform_indices = @transform_5, window_bounds = array<i64: 16, 128>}]} {
    %c0 = arith.constant 0 : index
    %c0_0 = arith.constant 0 : index
    %0 = vector.load %arg1[%c0, %c0_0] : memref<24x64xbf16, #tpu.memory_space<vmem>>, vector<24x64xbf16>
    %c0_1 = arith.constant 0 : index
    %c0_2 = arith.constant 0 : index
    %1 = vector.load %arg2[%c0_1, %c0_2] : memref<64x384xbf16, #tpu.memory_space<vmem>>, vector<64x384xbf16>
    %cst = arith.constant dense<0.000000e+00> : vector<24x384xf32>
    %2 = tpu.matmul %0, %1, %cst {dimension_numbers = #tpu.dot_dimension_numbers<[1], [0], [0], [1], [0, 0, 1, 1], [], []>} : vector<24x64xbf16>, vector<64x384xbf16>, vector<24x384xf32> -> vector<24x384xf32>
    %c0_3 = arith.constant 0 : index
    %c0_4 = arith.constant 0 : index
    %3 = vector.load %arg7[%c0_3, %c0_4] : memref<24x384xf32, #tpu.memory_space<vmem>>, vector<24x384xf32>
    tpu.vector_store %arg7[%c0_3, %c0_4], %2 {strides = array<i32>} : memref<24x384xf32, #tpu.memory_space<vmem>>, vector<24x384xf32>,
    %cst_5 = arith.constant 0.000000e+00 : bf16
    %4 = vector.broadcast %cst_5 : bf16 to vector<24x128xbf16>
    %c0_6 = arith.constant 0 : index
    %c0_7 = arith.constant 0 : index
    %5 = vector.load %arg8[%c0_6, %c0_7] : memref<24x128xbf16, #tpu.memory_space<vmem>>, vector<24x128xbf16>
    tpu.vector_store %arg8[%c0_6, %c0_7], %4 {strides = array<i32>} : memref<24x128xbf16, #tpu.memory_space<vmem>>, vector<24x128xbf16>,
    %c0_8 = arith.constant 0 : index
    %c0_9 = arith.constant 0 : index
    %6 = vector.load %arg3[%c0_8, %c0_9] : memref<1x128xf32, #tpu.memory_space<vmem>>, vector<1x128xf32>
    %c0_10 = arith.constant 0 : index
    %c0_11 = arith.constant 0 : index
    %7 = vector.load %arg7[%c0_10, %c0_11] : memref<24x384xf32, #tpu.memory_space<vmem>>, vector<16x128xf32>
    %c1 = arith.constant 1 : index
    %c128 = arith.constant 128 : index
    %8 = vector.load %arg7[%c1, %c128] : memref<24x384xf32, #tpu.memory_space<vmem>>, vector<16x128xf32>
    %9 = arith.addf %7, %8 : vector<16x128xf32>
    %c2 = arith.constant 2 : index
    %c256 = arith.constant 256 : index
    %10 = vector.load %arg7[%c2, %c256] : memref<24x384xf32, #tpu.memory_space<vmem>>, vector<16x128xf32>
    %11 = arith.addf %9, %10 : vector<16x128xf32>
    %12 = vector.broadcast %6 : vector<1x128xf32> to vector<16x128xf32>
    %13 = arith.addf %11, %12 : vector<16x128xf32>
    %cst_12 = arith.constant 0.000000e+00 : f32
    %14 = vector.broadcast %cst_12 : f32 to vector<16x128xf32>
    %15 = arith.maximumf %13, %14 : vector<16x128xf32>
    %16 = arith.truncf %15 : vector<16x128xf32> to vector<16x128xbf16>
    %c1_13 = arith.constant 1 : index
    %c0_14 = arith.constant 0 : index
    %17 = vector.load %arg8[%c1_13, %c0_14] : memref<24x128xbf16, #tpu.memory_space<vmem>>, vector<16x128xbf16>
    tpu.vector_store %arg8[%c1_13, %c0_14], %16 {strides = array<i32>} : memref<24x128xbf16, #tpu.memory_space<vmem>>, vector<16x128xbf16>,
    %c0_15 = arith.constant 0 : index
    %c0_16 = arith.constant 0 : index
    %18 = vector.load %arg8[%c0_15, %c0_16] : memref<24x128xbf16, #tpu.memory_space<vmem>>, vector<24x128xbf16>
    %c0_17 = arith.constant 0 : index
    %c0_18 = arith.constant 0 : index
    %19 = vector.load %arg4[%c0_17, %c0_18] : memref<128x384xbf16, #tpu.memory_space<vmem>>, vector<128x384xbf16>
    %cst_19 = arith.constant dense<0.000000e+00> : vector<24x384xf32>
    %20 = tpu.matmul %18, %19, %cst_19 {dimension_numbers = #tpu.dot_dimension_numbers<[1], [0], [0], [1], [0, 0, 1, 1], [], []>} : vector<24x128xbf16>, vector<128x384xbf16>, vector<24x384xf32> -> vector<24x384xf32>
    %c0_20 = arith.constant 0 : index
    %c0_21 = arith.constant 0 : index
    %21 = vector.load %arg9[%c0_20, %c0_21] : memref<24x384xf32, #tpu.memory_space<vmem>>, vector<24x384xf32>
    tpu.vector_store %arg9[%c0_20, %c0_21], %20 {strides = array<i32>} : memref<24x384xf32, #tpu.memory_space<vmem>>, vector<24x384xf32>,
    %c0_22 = arith.constant 0 : index
    %c0_23 = arith.constant 0 : index
    %22 = vector.load %arg5[%c0_22, %c0_23] : memref<1x128xf32, #tpu.memory_space<vmem>>, vector<1x128xf32>
    %c0_24 = arith.constant 0 : index
    %c0_25 = arith.constant 0 : index
    %23 = vector.load %arg9[%c0_24, %c0_25] : memref<24x384xf32, #tpu.memory_space<vmem>>, vector<16x128xf32>
    %c1_26 = arith.constant 1 : index
    %c128_27 = arith.constant 128 : index
    %24 = vector.load %arg9[%c1_26, %c128_27] : memref<24x384xf32, #tpu.memory_space<vmem>>, vector<16x128xf32>
    %25 = arith.addf %23, %24 : vector<16x128xf32>
    %c2_28 = arith.constant 2 : index
    %c256_29 = arith.constant 256 : index
    %26 = vector.load %arg9[%c2_28, %c256_29] : memref<24x384xf32, #tpu.memory_space<vmem>>, vector<16x128xf32>
    %27 = arith.addf %25, %26 : vector<16x128xf32>
    %28 = vector.broadcast %22 : vector<1x128xf32> to vector<16x128xf32>
    %29 = arith.addf %27, %28 : vector<16x128xf32>
    %30 = arith.negf %29 : vector<16x128xf32>
    %31 = math.exp %30 : vector<16x128xf32>
    %cst_30 = arith.constant 1.000000e+00 : f32
    %32 = vector.broadcast %cst_30 : f32 to vector<16x128xf32>
    %33 = arith.addf %32, %31 : vector<16x128xf32>
    %34 = arith.divf %32, %33 : vector<16x128xf32>
    %c0_31 = arith.constant 0 : index
    %c0_32 = arith.constant 0 : index
    %35 = vector.load %arg6[%c0_31, %c0_32] : memref<16x128xf32, #tpu.memory_space<vmem>>, vector<16x128xf32>
    tpu.vector_store %arg6[%c0_31, %c0_32], %34 {strides = array<i32>} : memref<16x128xf32, #tpu.memory_space<vmem>>, vector<16x128xf32>,
    return
  }
  func.func @transform_0(%arg0: i32) -> (i32, i32) {
    %c0_i32 = arith.constant 0 : i32
    %c0_i32_0 = arith.constant 0 : i32
    return %arg0, %c0_i32 : i32, i32
  }
  func.func @transform_1(%arg0: i32) -> (i32, i32) {
    %c0_i32 = arith.constant 0 : i32
    %c0_i32_0 = arith.constant 0 : i32
    %c0_i32_1 = arith.constant 0 : i32
    return %c0_i32, %c0_i32_0 : i32, i32
  }
  func.func @transform_2(%arg0: i32) -> (i32, i32) {
    %c0_i32 = arith.constant 0 : i32
    %c0_i32_0 = arith.constant 0 : i32
    %c0_i32_1 = arith.constant 0 : i32
    return %c0_i32, %c0_i32_0 : i32, i32
  }
  func.func @transform_3(%arg0: i32) -> (i32, i32) {
    %c0_i32 = arith.constant 0 : i32
    %c0_i32_0 = arith.constant 0 : i32
    %c0_i32_1 = arith.constant 0 : i32
    return %c0_i32, %c0_i32_0 : i32, i32
  }
  func.func @transform_4(%arg0: i32) -> (i32, i32) {
    %c0_i32 = arith.constant 0 : i32
    %c0_i32_0 = arith.constant 0 : i32
    %c0_i32_1 = arith.constant 0 : i32
    return %c0_i32, %c0_i32_0 : i32, i32
  }
  func.func @transform_5(%arg0: i32) -> (i32, i32) {
    %c0_i32 = arith.constant 0 : i32
    %c0_i32_0 = arith.constant 0 : i32
    return %arg0, %c0_i32 : i32, i32
  }
}

</mosaic_0001>

<bundles_post_ra>
// kernel: tpu_custom_call.1
= control target key start
LH: loop header
LB: loop body
LE: loop exit
PB: predicated region body
PF: predicated region fallthrough
CT: control target
= control target key end

     0   :  { %s1633_s0 = inlined_call_operand.hbm [shape: bf16[48,64], index: 0, kind: input, shape index: {}]   ;;  %s1634_s1 = inlined_call_operand.hbm [shape: bf16[64,384], index: 1, kind: input, shape index: {}]   ;;  %s1635_s2 = inlined_call_operand.vmem [shape: f32[1,128], index: 2, kind: input, shape index: {}]   ;;  %s1636_s3 = inlined_call_operand.hbm [shape: bf16[128,384], index: 3, kind: input, shape index: {}]   ;;  %s1637_s4 = inlined_call_operand.vmem [shape: f32[1,128], index: 4, kind: input, shape index: {}]   ;;  %s1638_s5 = inlined_call_operand.hbm [shape: f32[32,128], index: 5, kind: output, shape index: {}]  }
   0x1   :  { %1639 = sst [smem:[#allocation15_spill]] %s1634_s1 }
   0x2   :  { %10 = vsyncpa [#allocation6], 0 }
   0x3   :  { %12 = vsyncpa [#allocation6 + $0x1], 0 }
   0x4   :  { %13 = vsyncpa [#allocation9], 0 }
   0x5   :  { %14 = vsyncpa [#allocation7], 0 }
   0x6   :  { %16 = vsyncpa [#allocation7 + $0x1], 0  ;;  %s1456_s18 = smov 0   ;;  %s1458_s19 = smov 0  }
   0x7   :  { %s1460_s20 = smov 0   ;;  %s1462_s21 = smov 0  }
   0x8 LB: > { %s1477_s22 = sadd.s32 4294967295, %s1415_s21   ;;  %s946_s23 = sadd.s32 4294967294, %s1415_s21   ;;  %s1415_s21 = sphi %s1462_s21, %s1650_s21   ;;  %s1411_s20 = sphi %s1460_s20, %s1649_s20   ;;  %s1407_s19 = sphi %s1458_s19, %s1648_s19   ;;  %s1403_s18 = sphi %s1456_s18, %s1647_s18  }
   0x9   : > { %p42_p0 = scmp.ne.s32.totalorder %s1407_s19, %s1403_s18  ;;  %p43_p1 = scmp.eq.s32.totalorder %s1477_s22, 0 }
   0xa   : > { %p150_p2 = scmp.eq.s32.totalorder %s1477_s22, 1  ;;  %p156_p3 = scmp.eq.s32.totalorder %s946_s23, 1 }
   0xb   : > { %p1486_p4 = por %p43_p1, %p42_p0  ;;  %p947_p5 = scmp.ge.s32.totalorder %s1415_s21, 1 }
   0xc   : > { %p1491_p6 = por %p156_p3, %p42_p0  ;;  %p163_p7 = scmp.lt.s32.totalorder %s1415_s21, 3 }
   0xd   : > { %s1642_s1 = sld [smem:[#allocation15_spill]]  ;;  %s1417_s30 = smov [#allocation8]  }
   0xe   : > { %p1499_p8 = pnand %p947_p5, %p163_p7  ;;  %s176_s6 = sshll.u32 %s1417_s30, 4  ;;  %s177_s6 = int_to_ptr.vmem [resolvable:$true] %s176_s6 }
   0xf   : > { %s191_s9 = sshll.u32 %s1636_s3, 4  ;;  %s1418_s10 = smov 192   ;;  %s192_s9 = int_to_ptr.hbm [resolvable:$true] %s191_s9 }
  0x10   : > { %p1183_p9 = pneg %p1499_p8  ;;  %s1419_s11 = smov 12  }
  0x11   : > { %s1420_s12 = smov [#allocation10]   ;;  %s1512_s14 = sadd.s32 1, %s1415_s21  }
  0x12   : > { %p1184_p10 = pnand %p1183_p9, %p43_p1  ;;  %s193_s13 = sshll.u32 %s1420_s12, 4  ;;  %s194_s13 = int_to_ptr.vmem [resolvable:$true] %s193_s13 }
  0x13   : > { %s174_s28 = sshll.u32 %s1642_s1, 4  ;;  %s29_s15 = sadd.s32 1, %s1411_s20  ;;  %s175_s28 = int_to_ptr.hbm [resolvable:$true] %s174_s28 }
  0x14   : > { %1186 = dma.hbm_to_vmem [thread:$0]  (!%p1184_p10), %s175_s28, 1536, %s177_s6, [#allocation9], %s1418_s10, %s1418_s10, %s1419_s11  }
  0x15   : > { %1189 = dma.hbm_to_vmem [thread:$0]  (!%p1184_p10), %s192_s9, 3072, %s194_s13, [#allocation9], %s1418_s10, %s1418_s10, %s1419_s11  }
  0x16   : > { %s26_s16 = ssub.s32 %s1415_s21, %s1512_s14  ;;  %p36_p12 = scmp.ne.s32.totalorder %s1411_s20, %s1407_s19 }
  0x17   : > { %p27_p13 = scmp.eq.s32.totalorder %s26_s16, 0  ;;  %p37_p0 = scmp.eq.s32.totalorder %s1415_s21, 0 }
  0x18   : > { %p1522_p3 = por %p150_p2, %p36_p12  ;;  %p1200_p5 = scmp.lt.s32.totalorder %s1415_s21, 2 }
  0x19   : > { %s1528_s23 = scalar_select %p27_p13, %s1411_s20, %s29_s15  }
  0x1a   : > { %p38_p7 = por %p37_p0, %p36_p12  ;;  %s210_s26 = sand.u32 1, %s1411_s20  }
  0x1b   : > { %s1169_s27 = smul.u32 12, %s210_s26  ;;  %s211_s12 = scalar_lea.sflag [#allocation6], %s210_s26 }
  0x1c   : > { %s1121_s28 = smul.u32 12, %s1415_s21  ;;  %p1532_p9 = pnand %p1200_p5, %p38_p7 }
  0x1d   : > { %s214_s9 = scalar_lea.vmem [#allocation5], %s1169_s27  ;;  %s1322_s6 = scalar_lea.hbm %s1633_s0, 24 }
  0x1e   : > { %s219_s8 = scalar_lea.hbm %s1633_s0, %s1121_s28  ;;  %s222_s10 = sshll.u32 %s214_s9, 4  ;;  %s223_s10 = int_to_ptr.vmem [resolvable:$true] %s222_s10 }
  0x1f   : > { %s220_s11 = sshll.u32 %s219_s8, 4  ;;  %p1319_p10 = pneg %p1532_p9  ;;  %s221_s11 = int_to_ptr.hbm [resolvable:$true] %s220_s11 }
  0x20   : > { %s1315_s13 = sshra.s32 %s221_s11, 4  ;;  %s1316_s13 = int_to_ptr.hbm [resolvable:$true] %s1315_s13 }
  0x21   : > { %s1317_s15 = scalar_lea.hbm %s1316_s13, 12  ;;  %p1323_p0 = scmp.lt.s32.totalorder %s1316_s13, %s1633_s0 }
  0x22   : > { %p1318_p2 = scmp.ne.s32.totalorder %s1316_s13, %s1317_s15  ;;  %p1324_p5 = scmp.lt.s32.totalorder %s1322_s6, %s1317_s15 }
  0x24   : > { %p1320_p12 = pnand %p1319_p10, %p1318_p2  ;;  %p1325_p7 = por %p1324_p5, %p1323_p0 }
  0x26   : > { %p1321_p13 = pneg %p1320_p12 }
  0x28   : > { %p1326_p11 = pnand %p1325_p7, %p1321_p13 }
  0x2a   : > { %1329 = shalt.err (!%p1326_p11)
}
  0x2b   : > { %s1421_s26 = smov 64   ;;  %s1422_s27 = smov 4  }
  0x2c   : > { %1193 = dma.hbm_to_vmem [thread:$0]  (!%p1532_p9), %s221_s11, 192, %s223_s10, %s211_s12, %s1421_s26, %s1421_s26, %s1422_s27  }
  0x2d   : > { %234 = sbr.rel (%p1499_p8) target bundleno = 444 (0x1bc), region = 40  ;;  %s1552_s1 = sand.u32 (!%p1499_p8), 1, %s1407_s19  }
  0x2e   : > { %s1170_s8 = smul.u32 (!%p1499_p8), 12, %s1552_s1  ;;  %s237_s9 = scalar_lea.sflag (!%p1499_p8), [#allocation6], %s1552_s1 }
  0x30   : > { %s1556_s13 = scalar_lea.vmem (!%p1499_p8), [#allocation5], %s1170_s8 }
  0x32   : > { %1390 = dma.done.wait (%p1486_p4), %s237_s9, 192  }
  0x33   : > { %1392 = vsyncadd (%p1486_p4), %s237_s9, 4294967104 }
  0x34   : > { %1394 = dma.done.wait (%p43_p1), [#allocation9], 4608  }
  0x35   : > { %1396 = vsyncadd (%p43_p1), [#allocation9], 4294962688  ;;  %v1132_v0 = vld [vmem:[#allocation8 + $0x4c] sm:$0xf]  ;;  %v1000_v1 = vld [vmem:[#allocation8 + $0x54] sm:$0xf0] }
  0x36   : > { %v1006_v2 = vld [vmem:[#allocation8 + $0x50] sm:$0xf]  ;;  %v1003_v3 = vor.u32 %v1132_v0, %v1000_v1  ;;  %v1134_v4 = vld [vmem:[#allocation8 + $0x58] sm:$0xf0]  ;;  %v1129_v5 = vld [vmem:[#allocation8 + $0x34] sm:$0xf] }
  0x37   : > { %v988_v6 = vld [vmem:[#allocation8 + $0x3c] sm:$0xf0]  ;;  %v1007_v7 = vor.u32 %v1134_v4, %v1006_v2  ;;  %v994_v8 = vld [vmem:[#allocation8 + $0x38] sm:$0xf]  ;;  %v1131_v9 = vld [vmem:[#allocation8 + $0x40] sm:$0xf0] }
  0x38   : > { %v998_v10 = vld [vmem:[#allocation8 + $0x48] sm:$0xf]  ;;  %401 = vmatpush.bf16.msra.mxu1 %v1003_v3  ;;  %v991_v11 = vor.u32 %v1129_v5, %v988_v6  ;;  %v1133_v12 = vld [vmem:[#allocation8 + $0x50] sm:$0xf0]  ;;  %v995_v13 = vor.u32 %v1131_v9, %v994_v8  ;;  %v1126_v15 = vld [vmem:[#allocation8 + $0x1c] sm:$0xf] }
  0x39   : > { %419 = vmatpush.bf16.msra.mxu2 %v1007_v7  ;;  %v999_v14 = vor.u32 %v1133_v12, %v998_v10  ;;  %v976_v16 = vld [vmem:[#allocation8 + $0x24] sm:$0xf0]  ;;  %v986_v17 = vld [vmem:[#allocation8 + $0x30] sm:$0xf]  ;;  %v982_v18 = vld [vmem:[#allocation8 + $0x20] sm:$0xf] }
  0x3a   : > { %v1128_v19 = vld [vmem:[#allocation8 + $0x28] sm:$0xf0]  ;;  %v1130_v20 = vld [vmem:[#allocation8 + $0x38] sm:$0xf0]  ;;  %v979_v22 = vor.u32 %v1126_v15, %v976_v16  ;;  %v974_v23 = vld [vmem:[#allocation8 + $0x18] sm:$0xf] }
  0x3b   : > { %383 = vmatpush.bf16.msra.mxu0 %v999_v14  ;;  %v987_v21 = vor.u32 %v1130_v20, %v986_v17  ;;  %v1127_v24 = vld [vmem:[#allocation8 + $0x20] sm:$0xf0]  ;;  %v983_v25 = vor.u32 %v1128_v19, %v982_v18  ;;  %v964_v27 = vld [vmem:[#allocation8 + $0xc] sm:$0xf0]  ;;  %v970_v28 = vld [vmem:[#allocation8 + $0x8] sm:$0xf] }
  0x3c   : > { %402 = vmatpush.bf16.msra.mxu1 %v991_v11  ;;  %v1123_v26 = vld [vmem:[#allocation8 + $0x4] sm:$0xf]  ;;  %v1125_v29 = vld [vmem:[#allocation8 + $0x10] sm:$0xf0]  ;;  %v975_v30 = vor.u32 %v1127_v24, %v974_v23  ;;  %v962_v32 = vld [vmem:[#allocation8] sm:$0xf] }
  0x3d   : > { %420 = vmatpush.bf16.msra.mxu2 %v995_v13  ;;  %v967_v31 = vor.u32 %v1123_v26, %v964_v27  ;;  %v1124_v33 = vld [vmem:[#allocation8 + $0x8] sm:$0xf0]  ;;  %v971_v34 = vor.u32 %v1125_v29, %v970_v28  ;;  %vm372_vm0 = vcmask 523264   ;;  %v283_v37 = vld [vmem:[%s1556_s13 + $0x8] sm:$0xf]  ;;  %v1423_v49 = vmov 0  }
  0x3e   : > { %v1122_v35 = vld [vmem:[%s1556_s13] sm:$0xff]  ;;  %v963_v36 = vor.u32 %v1124_v33, %v962_v32  ;;  %v305_v38 = vunpack.c.l.b16 %v283_v37  ;;  %v1112_v40 = vld [vmem:[#allocation10 + $0xb0] sm:$0xf]  ;;  %v1159_v41 = vld [vmem:[#allocation10 + $0xb8] sm:$0xf0]  ;;  %vm454_vm1 = vcmask 1046528  }
  0x3f   : > { %384 = vmatpush.bf16.msra.mxu0 %v987_v21  ;;  %v1104_v42 = vld [vmem:[#allocation10 + $0xa8] sm:$0xf]  ;;  %v1113_v43 = vor.u32 %v1159_v41, %v1112_v40  ;;  %v1158_v44 = vld [vmem:[#allocation10 + $0xb0] sm:$0xf0]  ;;  %v1157_v45 = vld [vmem:[#allocation10 + $0xac] sm:$0xf] }
  0x40   : > { %403 = vmatpush.bf16.msra.mxu1 %v979_v22  ;;  %v307_v39 = vpack.c.b16 %v305_v38, %v305_v38  ;;  %v1106_v46 = vld [vmem:[#allocation10 + $0xb4] sm:$0xf0]  ;;  %v1105_v47 = vor.u32 %v1158_v44, %v1104_v42  ;;  %442 = vst [vmem:[#allocation3] sm:$0xf] %v1423_v49  ;;  %v1156_v51 = vld [vmem:[#allocation10 + $0xa0] sm:$0xf0] }
  0x41   : > { %421 = vmatpush.bf16.msra.mxu2 %v983_v25  ;;  %v1109_v48 = vor.u32 %v1157_v45, %v1106_v46  ;;  %443 = vst [vmem:[#allocation3 + $0x4] sm:$0xf] %v1423_v49  ;;  %v1100_v50 = vld [vmem:[#allocation10 + $0x98] sm:$0xf]  ;;  %v1092_v52 = vld [vmem:[#allocation10 + $0x90] sm:$0xf] }
  0x42   : > { %697 = vmatpush.bf16.msra.mxu3 %v1105_v47  ;;  %v1101_v53 = vor.u32 %v1156_v51, %v1100_v50  ;;  %v1155_v54 = vld [vmem:[#allocation10 + $0x98] sm:$0xf0]  ;;  %v1154_v55 = vld [vmem:[#allocation10 + $0x94] sm:$0xf]  ;;  %v1094_v56 = vld [vmem:[#allocation10 + $0x9c] sm:$0xf0] }
  0x43   : > { %385 = vmatpush.bf16.msra.mxu0 %v975_v30  ;;  %v1093_v57 = vor.u32 %v1155_v54, %v1092_v52  ;;  %v1097_v58 = vor.u32 %v1154_v55, %v1094_v56  ;;  %444 = vst [vmem:[#allocation3 + $0x8] sm:$0xf] %v1423_v49  ;;  %v1088_v60 = vld [vmem:[#allocation10 + $0x80] sm:$0xf]  ;;  %v1153_v61 = vld [vmem:[#allocation10 + $0x88] sm:$0xf0] }
  0x44   : > { %404 = vmatpush.bf16.msra.mxu1 %v967_v31  ;;  %v1089_v62 = vor.u32 %v1153_v61, %v1088_v60  ;;  %v1080_v63 = vld [vmem:[#allocation10 + $0x78] sm:$0xf]  ;;  %v1152_v0 = vld [vmem:[#allocation10 + $0x80] sm:$0xf0]  ;;  %v1151_v1 = vld [vmem:[#allocation10 + $0x7c] sm:$0xf] }
  0x45   : > { %422 = vmatpush.bf16.msra.mxu2 %v971_v34  ;;  %v1081_v3 = vor.u32 %v1152_v0, %v1080_v63  ;;  %v1082_v4 = vld [vmem:[#allocation10 + $0x84] sm:$0xf0]  ;;  %v1150_v7 = vld [vmem:[#allocation10 + $0x70] sm:$0xf0]  ;;  %v1068_v8 = vld [vmem:[#allocation10 + $0x60] sm:$0xf] }
  0x46   : > { %698 = vmatpush.bf16.msra.mxu3 %v1093_v57  ;;  %v1085_v5 = vor.u32 %v1151_v1, %v1082_v4  ;;  %v1076_v6 = vld [vmem:[#allocation10 + $0x68] sm:$0xf]  ;;  %v1149_v10 = vld [vmem:[#allocation10 + $0x68] sm:$0xf0]  ;;  %v1148_v11 = vld [vmem:[#allocation10 + $0x64] sm:$0xf] }
  0x47   : > { %1010 = vmatmul.msk.bf16.vlgmr.msra.gmra.mxu1 %vm372_vm0, %v1122_v35  ;;  %386 = vmatpush.bf16.msra.mxu0 %v963_v36  ;;  %v1077_v9 = vor.u32 %v1150_v7, %v1076_v6  ;;  %v1070_v12 = vld [vmem:[#allocation10 + $0x6c] sm:$0xf0]  ;;  %v1069_v14 = vor.u32 %v1149_v10, %v1068_v8  ;;  %v1147_v21 = vld [vmem:[#allocation10 + $0x58] sm:$0xf0]  ;;  %v1056_v22 = vld [vmem:[#allocation10 + $0x48] sm:$0xf] }
  0x48   : > { %1012 = vmatmul.msk.bf16.vlgmr.msra.gmra.mxu2 %vm372_vm0, %v1122_v35  ;;  %733 = vmatpush.bf16.msrb.mxu1 %v1113_v43  ;;  %v1073_v15 = vor.u32 %v1148_v11, %v1070_v12  ;;  %v1064_v20 = vld [vmem:[#allocation10 + $0x50] sm:$0xf]  ;;  %v1146_v23 = vld [vmem:[#allocation10 + $0x50] sm:$0xf0]  ;;  %v1145_v27 = vld [vmem:[#allocation10 + $0x4c] sm:$0xf] }
  0x49   : > { %1161 = vmatpush.bf16.msrb.mxu2 %v1109_v48  ;;  %v1065_v25 = vor.u32 %v1147_v21, %v1064_v20  ;;  %v1057_v26 = vor.u32 %v1146_v23, %v1056_v22  ;;  %v1058_v28 = vld [vmem:[#allocation10 + $0x54] sm:$0xf0]  ;;  %vm470_vm2 = vcmask 1045504   ;;  %v1144_v31 = vld [vmem:[#allocation10 + $0x40] sm:$0xf0]  ;;  %vm512_vm3 = vcmask 1043456  }
  0x4a   : > { %1008 = vmatmul.msk.bf16.vlgmr.msra.gmra.mxu0 %vm372_vm0, %v1122_v35  ;;  %699 = vmatpush.bf16.msra.mxu3 %v1081_v3  ;;  %v1061_v29 = vor.u32 %v1145_v27, %v1058_v28  ;;  %v1052_v30 = vld [vmem:[#allocation10 + $0x38] sm:$0xf]  ;;  %v1044_v32 = vld [vmem:[#allocation10 + $0x30] sm:$0xf]  ;;  %v1143_v35 = vld [vmem:[#allocation10 + $0x38] sm:$0xf0] }
  0x4b   : > { %715 = vmatpush.bf16.msrb.mxu0 %v1109_v48  ;;  %v1053_v34 = vor.u32 %v1144_v31, %v1052_v30  ;;  %v1142_v36 = vld [vmem:[#allocation10 + $0x34] sm:$0xf]  ;;  %v1046_v37 = vld [vmem:[#allocation10 + $0x3c] sm:$0xf0]  ;;  %v1581_v40 = vld [vmem:[%s1635_s2] ss:$0 sm:$0xff]  ;;  %v1045_v41 = vor.u32 %v1143_v35, %v1044_v32 }
  0x4c   : > { %734 = vmatpush.bf16.msrb.mxu1 %v1101_v53  ;;  %v1049_v42 = vor.u32 %v1142_v36, %v1046_v37  ;;  %v1040_v43 = vld [vmem:[#allocation10 + $0x20] sm:$0xf]  ;;  %v1141_v44 = vld [vmem:[#allocation10 + $0x28] sm:$0xf0]  ;;  %v1032_v48 = vld [vmem:[#allocation10 + $0x18] sm:$0xf] }
  0x4d   : > { %1162 = vmatpush.bf16.msrb.mxu2 %v1097_v58  ;;  %v1041_v50 = vor.u32 %v1141_v44, %v1040_v43  ;;  %v1140_v51 = vld [vmem:[#allocation10 + $0x20] sm:$0xf0]  ;;  %v1139_v52 = vld [vmem:[#allocation10 + $0x1c] sm:$0xf]  ;;  %v1034_v55 = vld [vmem:[#allocation10 + $0x24] sm:$0xf0] }
  0x4e   : > { %700 = vmatpush.bf16.msra.mxu3 %v1069_v14  ;;  %v1033_v54 = vor.u32 %v1140_v51, %v1032_v48  ;;  %v1028_v56 = vld [vmem:[#allocation10 + $0x8] sm:$0xf]  ;;  %v1138_v57 = vld [vmem:[#allocation10 + $0x10] sm:$0xf0]  ;;  %v1020_v60 = vld [vmem:[#allocation10] sm:$0xf] }
  0x4f   : > { %716 = vmatpush.bf16.msrb.mxu0 %v1097_v58  ;;  %v1137_v61 = vld [vmem:[#allocation10 + $0x8] sm:$0xf0]  ;;  %v1022_v63 = vld [vmem:[#allocation10 + $0xc] sm:$0xf0]  ;;  %v1029_v1 = vor.u32 %v1138_v57, %v1028_v56  ;;  %vm513_vm4 = vsmask.f32 7938 }
  0x50   : > { %735 = vmatpush.bf16.msrb.mxu1 %v1089_v62  ;;  %v1136_v62 = vld [vmem:[#allocation10 + $0x4] sm:$0xf]  ;;  %vm514_vm5 = vmand %vm512_vm3, %vm513_vm4  ;;  %v515_v14 = vld [vmem:[#allocation3] sm:$0xf]  ;;  %vm489_vm6 = vsmask.f32 256 }
  0x51   : > { %1163 = vmatpush.bf16.msrb.mxu2 %v1085_v5  ;;  %v1025_v3 = vor.u32 %v1136_v62, %v1022_v63  ;;  %vm490_vm7 = vsmask.f32 4368  ;;  %vm519_vm8 = vcmask 1040384   ;;  %v521_v31 = vld [vmem:[#allocation3 + $0x8] sm:$0x1]  ;;  %s955_s11 = sshll.u32 %s1552_s1, 4 }
  0x52   : > { %701 = vmatpush.bf16.msra.mxu3 %v1057_v26  ;;  %vm491_vm9 = vmor %vm489_vm6, %vm490_vm7  ;;  %s277_s12 = scalar_lea.vmem [#allocation11], %s955_s11  ;;  %s1160_s15 = sshll.u32 %s1477_s22, 4 }
  0x53   : > { %717 = vmatpush.bf16.msrb.mxu0 %v1085_v5  ;;  %vm520_vm10 = vmand %vm519_vm8, %vm489_vm6  ;;  %s850_s7 = scalar_lea.hbm %s1638_s5, %s1160_s15  ;;  %s851_s28 = sshll.u32 %s277_s12, 4  ;;  %s852_s28 = int_to_ptr.vmem [resolvable:$true] %s851_s28 }
  0x54   : > { %736 = vmatpush.bf16.msrb.mxu1 %v1077_v9  ;;  %s853_s26 = sshll.u32 %s850_s7, 4  ;;  %s839_s22 = scalar_lea.sflag [#allocation7], %s1552_s1  ;;  %s854_s26 = int_to_ptr.hbm [resolvable:$true] %s853_s26 }
  0x55   : > { %1164 = vmatpush.bf16.msrb.mxu2 %v1073_v15  ;;  %s1359_s27 = sshra.s32 %s854_s26, 4  ;;  %s1365_s24 = scalar_lea.hbm %s1638_s5, 32  ;;  %s1360_s27 = int_to_ptr.hbm [resolvable:$true] %s1359_s27 }
  0x56   : > { %702 = vmatpush.bf16.msra.mxu3 %v1045_v41  ;;  %s1361_s8 = scalar_lea.hbm %s1360_s27, 16  ;;  %p1366_p11 = scmp.lt.s32.totalorder %s1360_s27, %s1638_s5 }
  0x57   : > { %1011 = vmatmul.msk.bf16.gmra.mxu1 %vm372_vm0, %v307_v39  ;;  %718 = vmatpush.bf16.msrb.mxu0 %v1073_v15  ;;  %p1362_p1 = scmp.ne.s32.totalorder %s1360_s27, %s1361_s8  ;;  %p1367_p9 = scmp.lt.s32.totalorder %s1365_s24, %s1361_s8 }
  0x58   : > { %1013 = vmatmul.msk.bf16.gmra.mxu2 %vm372_vm0, %v307_v39  ;;  %737 = vmatpush.bf16.msrb.mxu1 %v1065_v25 }
  0x59   : > { %1165 = vmatpush.bf16.msrb.mxu2 %v1061_v29  ;;  %p1363_p4 = pnand %p1362_p1, %p1522_p3  ;;  %p1368_p2 = por %p1367_p9, %p1366_p11 }
  0x5a   : > { %1009 = vmatmul.msk.bf16.gmra.mxu0 %vm372_vm0, %v307_v39  ;;  %703 = vmatpush.bf16.msra.mxu3 %v1033_v54 }
  0x5b   : > { %719 = vmatpush.bf16.msrb.mxu0 %v1061_v29  ;;  %p1364_p8 = pneg %p1363_p4 }
  0x5c   : > { %738 = vmatpush.bf16.msrb.mxu1 %v1053_v34 }
  0x5d   : > { %1166 = vmatpush.bf16.msrb.mxu2 %v1049_v42  ;;  %p1369_p10 = pnand %p1368_p2, %p1364_p8 }
  0x5f   : > { %720 = vmatpush.bf16.msrb.mxu0 %v1049_v42 }
  0x60   : > { %739 = vmatpush.bf16.msrb.mxu1 %v1041_v50 }
  0x64   : > { %740 = vmatpush.bf16.msrb.mxu1 %v1029_v1 }
  0xc4   : > { %v406_v59 = vpop.f32.mrf.mxu1 }
  0xc5   : > { %434 = vst [vmem:[#allocation2] sm:$0xff] %v406_v59  ;;  %v1037_v59 = vor.u32 %v1139_v52, %v1034_v55  ;;  %v1246_v55 = vld [vmem:[%s1637_s4] ss:$0 sm:$0xff] }
  0xc7   : > { %v388_v2 = vpop.f32.mrf.mxu0  ;;  %721 = vmatpush.bf16.msrb.mxu0 %v1037_v59  ;;  %1167 = vmatpush.bf16.msrb.mxu2 %v1037_v59 }
  0xcb   : > { %v424_v13 = vpop.f32.mrf.mxu2  ;;  %722 = vmatpush.bf16.msrb.mxu0 %v1025_v3  ;;  %1168 = vmatpush.bf16.msrb.mxu2 %v1025_v3 }
  0xcc   : > { %v448_v16 = vld [vmem:[#allocation2] sm:$0xfe]  ;;  %435 = vst [vmem:[#allocation2 + $0x18] sm:$0xff] %v424_v13  ;;  %v1568_v17 = vpop.f32.mrf.mxu1 }
  0xcd   : > { %v455_v18 = vrot.slane %v448_v16, 1  ;;  %v456_v19 = vrot.slane %v1568_v17, 1 }
  0xcf   : > { %v1571_v24 = vpop.f32.mrf.mxu0  ;;  %v457_v33 = vsel %vm454_vm1, %v455_v18, %v456_v19 }
  0xd0   : > { %v462_v49 = vadd.f32 %v457_v33, %v388_v2  ;;  %v1021_v2 = vor.u32 %v1137_v61, %v1020_v60 }
  0xd2   : > { %704 = vmatpush.bf16.msra.mxu3 %v1021_v2 }
  0xd3   : > { %v464_v38 = vld [vmem:[#allocation2 + $0x18] sm:$0xfc]  ;;  %v1576_v39 = vpop.f32.mrf.mxu2 }
  0xd4   : > { %v471_v45 = vrot.slane %v464_v38, 2  ;;  %v472_v46 = vrot.slane %v1576_v39, 2  ;;  %v411_v47 = vpop.f32.mrf.mxu1 }
  0xd5   : > { %440 = vst [vmem:[#allocation2 + $0x38] sm:$0xff] %v411_v47 }
  0xd6   : > { %v473_v53 = vsel %vm470_vm2, %v471_v45, %v472_v46 }
  0xd7   : > { %v478_v58 = vadd.f32 %v473_v53, %v462_v49 }
  0xd9   : > { %v483_v0 = vadd.f32 %v1581_v40, %v478_v58 }
  0xdb   : > { %v485_v4 = vmax.f32 %v483_v0, 0.0  ;;  %v429_v5 = vpop.f32.mrf.mxu2 }
  0xdc   : > { %v450_v6 = vld [vmem:[#allocation2 + $0x38] sm:$0x1]  ;;  %441 = vst [vmem:[#allocation2 + $0x8] sm:$0xff] %v429_v5  ;;  %v413_v7 = vpop.f32.mrf.mxu1 }
  0xdd   : > { %v487_v8 = vpack.c.bf16 %v485_v4, %v485_v4  ;;  %v458_v9 = vrot.slane %v450_v6, 1 }
  0xdf   : > { %v493_v10 = vshrl.u32 %v487_v8, 16  ;;  %v496_v12 = vshll.u32 %v487_v8, 16  ;;  %v459_v13 = vsel %vm454_vm1, %v456_v19, %v458_v9  ;;  %v393_v19 = vpop.f32.mrf.mxu0 }
  0xe0   : > { %v463_v21 = vadd.f32 %v459_v13, %v1571_v24 }
  0xe1   : > { %v495_v11 = vrot.slane %v493_v10, 7 }
  0xe3   : > { %v498_v15 = vor.u32 %v496_v12, %v495_v11  ;;  %v466_v16 = vld [vmem:[#allocation2 + $0x8] sm:$0x3]  ;;  %v431_v18 = vpop.f32.mrf.mxu2  ;;  %v499_v24 = vrot.slane %v495_v11, 4 }
  0xe4   : > { %v474_v20 = vrot.slane %v466_v16, 2 }
  0xe5   : > { %v516_v22 = vsel %vm514_vm5, %v498_v15, %v515_v14 }
  0xe6   : > { %v475_v23 = vsel %vm470_vm2, %v472_v46, %v474_v20  ;;  %517 = vst [vmem:[#allocation3] sm:$0xf] %v516_v22 }
  0xe7   : > { %v479_v25 = vadd.f32 %v475_v23, %v463_v21  ;;  %v395_v36 = vpop.f32.mrf.mxu0 }
  0xe9   : > { %v484_v26 = vadd.f32 %v1581_v40, %v479_v25 }
  0xeb   : > { %v486_v27 = vmax.f32 %v484_v26, 0.0 }
  0xed   : > { %v488_v28 = vpack.c.bf16 %v486_v27, %v486_v27 }
  0xef   : > { %v501_v17 = vshrl.u32 %v488_v28, 16  ;;  %v504_v30 = vshll.u32 %v488_v28, 16 }
  0xf1   : > { %v503_v29 = vrot.slane %v501_v17, 7 }
  0xf3   : > { %v506_v32 = vor.u32 %v504_v30, %v503_v29  ;;  %v508_v33 = vrot.slane %v503_v29, 4 }
  0xf5   : > { %v507_v34 = vsel %vm491_vm9, %v499_v24, %v506_v32  ;;  %v522_v35 = vsel %vm520_vm10, %v508_v33, %v521_v31 }
  0xf6   : > { %518 = vst [vmem:[#allocation3 + $0x4] sm:$0xf] %v507_v34 }
  0xf7   : > { %523 = vst [vmem:[#allocation3 + $0x8] sm:$0x1] %v522_v35 }
  0xfd   : > { %v1135_v37 = vld [vmem:[#allocation3] sm:$0xff] }
  0xfe   : > { %v526_v38 = vld [vmem:[#allocation3 + $0x8] sm:$0xf]  ;;  %705 = vmatmul.bf16.vlgmr.msra.gmra.mxu3 %v1135_v37  ;;  %723 = vmatmul.bf16.vlgmr.msrb.gmra.mxu0 %v1135_v37 }
  0xff   : > { %v564_v39 = vunpack.c.l.b16 %v526_v38  ;;  %741 = vmatmul.bf16.vlgmr.msrb.gmra.mxu1 %v1135_v37 }
 0x101   : > { %v566_v40 = vpack.c.b16 %v564_v39, %v564_v39 }
 0x103   : > { %728 = vmatmul.bf16.vlgmr.msrb.gmra.mxu2 %v566_v40 }
 0x10e   : > { %710 = vmatmul.bf16.gmra.mxu3 %v566_v40 }
 0x10f   : > { %746 = vmatmul.bf16.gmra.mxu1 %v566_v40 }
 0x17b   : > { %v724_v41 = vpop.f32.mrf.mxu0 }
 0x17c   : > { %752 = vst [vmem:[#allocation4 + $0x8] sm:$0xff] %v724_v41  ;;  %v742_v42 = vpop.f32.mrf.mxu1 }
 0x17d   : > { %753 = vst [vmem:[#allocation4 + $0x38] sm:$0xff] %v742_v42 }
 0x181   : > { %v706_v43 = vpop.f32.mrf.mxu3 }
 0x183   : > { %v763_v44 = vld [vmem:[#allocation4 + $0x8] sm:$0xfe]  ;;  %v726_v45 = vpop.f32.mrf.mxu0 }
 0x184   : > { %v769_v46 = vrot.slane %v763_v44, 1  ;;  %v778_v47 = vld [vmem:[#allocation4 + $0x38] sm:$0xfc]  ;;  %v770_v48 = vrot.slane %v726_v45, 1  ;;  %v744_v49 = vpop.f32.mrf.mxu1 }
 0x185   : > { %v784_v50 = vrot.slane %v778_v47, 2  ;;  %v785_v52 = vrot.slane %v744_v49, 2 }
 0x186   : > { %v729_v51 = vpop.f32.mrf.mxu2  ;;  %v771_v53 = vsel %vm454_vm1, %v769_v46, %v770_v48 }
 0x187   : > { %758 = vst [vmem:[#allocation4 + $0x20] sm:$0xff] %v729_v51  ;;  %v776_v54 = vadd.f32 %v771_v53, %v706_v43  ;;  %v786_v56 = vsel %vm470_vm2, %v784_v50, %v785_v52 }
 0x189   : > { %v708_v57 = vpop.f32.mrf.mxu3  ;;  %v791_v58 = vadd.f32 %v786_v56, %v776_v54 }
 0x18b   : > { %v796_v59 = vadd.f32 %v1246_v55, %v791_v58 }
 0x18c   : > { %v747_v60 = vpop.f32.mrf.mxu1 }
 0x18d   : > { %759 = vst [vmem:[#allocation4 + $0x18] sm:$0xff] %v747_v60  ;;  %v1114_v63 = vmul.f32 -1.442695, %v796_v59 }
 0x18e   : > { %v765_v61 = vld [vmem:[#allocation4 + $0x20] sm:$0x1]  ;;  %v731_v62 = vpop.f32.mrf.mxu2 }
 0x18f   : > { %v772_v0 = vrot.slane %v765_v61, 1  ;;  %1247 = vpow2.f32 %v1114_v63 }
 0x191   : > { %v711_v1 = vpop.f32.mrf.mxu3  ;;  %v773_v2 = vsel %vm454_vm1, %v770_v48, %v772_v0 }
 0x192   : > { %v777_v7 = vadd.f32 %v773_v2, %v708_v57 }
 0x194   : > { %v780_v3 = vld [vmem:[#allocation4 + $0x18] sm:$0x3]  ;;  %v749_v4 = vpop.f32.mrf.mxu1 }
 0x195   : > { %v1248_v5 = vpop.eup %1247  ;;  %v787_v6 = vrot.slane %v780_v3, 2 }
 0x196   : > { %v804_v8 = vadd.f32 1.0, %v1248_v5 }
 0x197   : > { %v788_v9 = vsel %vm470_vm2, %v785_v52, %v787_v6 }
 0x198   : > { %v792_v10 = vadd.f32 %v788_v9, %v777_v7  ;;  %1249 = vrcp.f32 %v804_v8  ;;  %v817_v18 = vand.u32 2147483648, %v804_v8  ;;  %v815_v21 = vand.u32 2147483647, %v804_v8 }
 0x199   : > { %v713_v11 = vpop.f32.mrf.mxu3  ;;  %vm811_vm12 = vweird.f32 %v804_v8 }
 0x19a   : > { %v797_v12 = vadd.f32 %v1246_v55, %v792_v10  ;;  %v818_v26 = vor.u32 1.1754944e-38, %v817_v18  ;;  %vm816_vm14 = vcmp.eq.f32.partialorder %v815_v21, 8.507059e+37 }
 0x19c   : > { %v1115_v13 = vmul.f32 -1.442695, %v797_v12 }
 0x19e   : > { %v1250_v14 = vpop.eup %1249  ;;  %1251 = vpow2.f32 %v1115_v13 }
 0x19f   : > { %v807_v15 = vmul.f32 %v1250_v14, %v804_v8  ;;  %vm812_vm11 = vweird.f32 %v1250_v14 }
 0x1a0   : > { %vm813_vm13 = vmor %vm811_vm12, %vm812_vm11 }
 0x1a1   : > { %v808_v16 = vsub.f32 1.0, %v807_v15 }
 0x1a3   : > { %v809_v20 = vmul.f32 %v1250_v14, %v808_v16 }
 0x1a4   : > { %v1252_v22 = vpop.eup %1251 }
 0x1a5   : > { %v805_v23 = vadd.f32 1.0, %v1252_v22  ;;  %v810_v25 = vadd.f32 %v1250_v14, %v809_v20 }
 0x1a7   : > { %v814_v27 = vsel %vm813_vm13, %v1250_v14, %v810_v25  ;;  %1253 = vrcp.f32 %v805_v23  ;;  %v832_v30 = vand.u32 2147483648, %v805_v23  ;;  %v830_v24 = vand.u32 2147483647, %v805_v23 }
 0x1a8   : > { %v819_v28 = vsel %vm816_vm14, %v818_v26, %v814_v27  ;;  %vm826_vm0 = vweird.f32 %v805_v23 }
 0x1a9   : > { %836 = vst [vmem:[%s277_s12] sm:$0xff] %v819_v28  ;;  %v833_v33 = vor.u32 1.1754944e-38, %v832_v30  ;;  %vm831_vm2 = vcmp.eq.f32.partialorder %v830_v24, 8.507059e+37 }
 0x1ad   : > { %v1254_v17 = vpop.eup %1253 }
 0x1ae   : > { %v822_v19 = vmul.f32 %v1254_v17, %v805_v23  ;;  %vm827_vm15 = vweird.f32 %v1254_v17 }
 0x1af   : > { %vm828_vm1 = vmor %vm826_vm0, %vm827_vm15 }
 0x1b0   : > { %v823_v29 = vsub.f32 1.0, %v822_v19 }
 0x1b2   : > { %v824_v31 = vmul.f32 %v1254_v17, %v823_v29 }
 0x1b4   : > { %v825_v32 = vadd.f32 %v1254_v17, %v824_v31 }
 0x1b6   : > { %v829_v34 = vsel %vm828_vm1, %v1254_v17, %v825_v32 }
 0x1b7   : > { %v834_v35 = vsel %vm831_vm2, %v833_v33, %v829_v34 }
 0x1b8   : > { %837 = vst [vmem:[%s277_s12 + $0x8] sm:$0xff] %v834_v35 }
 0x1b9   : > { %1372 = shalt.err (!%p1369_p10)
}
 0x1ba   : > { %s1424_s1 = smov 128   ;;  %s1425_s10 = smov 8  }
 0x1bb   : > { %1181 = dma.vmem_to_hbm [thread:$0]  (%p1522_p3), %s852_s28, 256, %s854_s26, %s839_s22, %s1424_s1, %s1424_s1, %s1425_s10  }
 0x1bc PF: > { %s868_s11 = sand.u32 1, %s1403_s18   ;;  %p1646_p12 = scmp.ge.s32.totalorder %s1415_s21, 2 }
 0x1bd   : > { %s869_s12 = scalar_lea.sflag [#allocation7], %s868_s11 }
 0x1be   : > { %p1195_p13 = pnand %p1646_p12, %p1491_p6 }
 0x1c0   : > { %p1196_p0 = pneg %p1195_p13 }
 0x1c2   : > { %1398 = dma.done.wait (%p1196_p0), %s869_s12, 256  }
 0x1c3   : > { %1400 = vsyncadd (%p1196_p0), %s869_s12, 4294967040  ;;  %p19_p5 = scmp.ge.s32.totalorder %s1512_s14, 4   ;;  %s1647_s18 = smov %s1407_s19 }
 0x1c4   : > { %s1648_s19 = smov %s1411_s20  ;;  %s1649_s20 = smov %s1528_s23 }
 0x1c5   : > { %s1650_s21 = smov %s1512_s14  ;;  %21 = sbr.rel (!%p19_p5) target bundleno = 8 (0x8), region = 93 }
 0x1ca   :  { %875 = vsyncpa [#allocation6], 1 }
 0x1cb   :  { %877 = vsyncpa [#allocation6 + $0x1], 1 }
 0x1cc   :  { %878 = vsyncpa [#allocation9], 1 }
 0x1cd   :  { %879 = vsyncpa [#allocation7], 1 }
 0x1ce   :  { %881 = vsyncpa [#allocation7 + $0x1], 1 }

</bundles_post_ra>
